<compile_context>
chip_gen: v7x
topology: tpu7x:2x2x1
jax: 0.10.0
libtpu: 0.0.40
codegen_flags: <defaults>
</compile_context>

<pallas_src>
import jax
import jax.numpy as jnp
from jax.experimental import pallas as pl
from jax.experimental.pallas import tpu as pltpu

_TARGET_TILE_BYTES = 16 << 20   # ~16 MiB of input per grid step (amortizes step overhead)
_MIN_PALLAS_BYTES = 256 << 10   # below this, fused XLA is strictly faster


def _linreg_kernel(w_ref, b_ref, x_ref, o_ref):
    # Scalars live in SMEM; broadcast over the VMEM tile on the VPU.
    # Accumulate in f32 (matches PyTorch promotion), cast on store.
    y = w_ref[0] * x_ref[...].astype(jnp.float32) + b_ref[0]
    o_ref[...] = y.astype(o_ref.dtype)


def _physical_vmem_bytes() -> int:
    """Best-effort per-core VMEM query; conservative 64 MiB fallback (v7x)."""
    try:
        info = pltpu.get_tpu_info()
        v = getattr(info, "vmem_capacity_bytes", None)
        if v:
            return int(v)
    except Exception:
        pass
    return 64 << 20  # v7x per-TC; v5e/v6e have 128 MiB but this is always safe


def _dimension_semantics(num_blocks: int):
    """CORE_PARALLEL on v7x (2 TCs/chip) so blocks shard across cores."""
    if num_blocks < 2:
        return ("arbitrary",)
    kind = ""
    try:
        kind = jax.devices()[0].device_kind.lower()
    except Exception:
        pass
    if "v7" in kind or "7x" in kind:
        try:
            return (pltpu.CORE_PARALLEL,)
        except AttributeError:
            pass
    return ("parallel",)


def _pick_cols(x: jax.Array, n: int) -> int:
    """Lane-dense column width. Prefer a zero-copy reshape (no HBM pad copy)."""
    last = int(x.shape[-1]) if x.ndim >= 1 else 0
    if 128 <= last <= 4096 and last % 128 == 0:
        return last                      # x.reshape(-1, last) is free
    if n % 512 == 0:
        return 512
    if n % 256 == 0:
        return 256
    if n % 128 == 0:
        return 128
    return 512                           # genuinely ragged -> rare pad path


def linear_regression(x: jax.Array, w: jax.Array, b: jax.Array,
                      *, force_pallas: bool = False,
                      tile_bytes_override: int | None = None) -> jax.Array:
    """y = w * x + b with scalar (shape (1,)) f32 parameters; any x shape."""
    x = jnp.asarray(x)
    w32 = jnp.asarray(w, jnp.float32).reshape(-1)[:1]
    b32 = jnp.asarray(b, jnp.float32).reshape(-1)[:1]

    out_dtype = jnp.result_type(x.dtype, jnp.float32)
    n = x.size
    itemsize = x.dtype.itemsize
    out_itemsize = out_dtype.itemsize

    # Tiny inputs: fused XLA elementwise beats the kernel-launch cost.
    if n == 0 or (not force_pallas and n * itemsize < _MIN_PALLAS_BYTES):
        return (w32[0] * x.astype(jnp.float32) + b32[0]).astype(out_dtype)

    # --- Lane-dense 2-D slab (rows, cols); zero-copy for 128-aligned shapes. ---
    cols = _pick_cols(x, n)
    rows = pl.cdiv(n, cols)
    flat = x.reshape(-1)
    padded = rows * cols != n
    if padded:  # only genuinely ragged totals (n % 128 != 0) pay this copy
        flat = jnp.pad(flat, (0, rows * cols - n))
    x2 = flat.reshape(rows, cols)

    # --- Generation-aware tile sizing (2 buffers x (in + out) must fit). ---
    phys = _physical_vmem_bytes()
    budget = max(4 << 20, phys - (16 << 20))          # pipeline budget w/ headroom
    elem_bytes = itemsize + out_itemsize
    target_in_bytes = tile_bytes_override or _TARGET_TILE_BYTES

    sub = {1: 32, 2: 16}.get(itemsize, 8)             # dtype-aware sublane multiple
    max_rows_budget = max(sub, budget // (2 * cols * elem_bytes))
    target_rows = max(sub, target_in_bytes // (cols * itemsize))
    tile_rows = max(sub, (min(max_rows_budget, target_rows) // sub) * sub)
    if tile_rows >= rows:
        tile_rows = rows                               # single full-extent block

    num_blocks = pl.cdiv(rows, tile_rows)              # partial last block is masked
    grid = (num_blocks,)
    index_map = lambda i: (i, 0)

    pipe_bytes = 2 * tile_rows * cols * elem_bytes     # double-buffered in + out
    vmem_limit = int(min(phys - (4 << 20), max(32 << 20, pipe_bytes + (8 << 20))))

    slab_elems = rows * cols
    cost = pl.CostEstimate(
        flops=2 * slab_elems,
        transcendentals=0,
        bytes_accessed=slab_elems * elem_bytes + 2 * 4,
    )

    out = pl.pallas_call(
        _linreg_kernel,
        out_shape=jax.ShapeDtypeStruct((rows, cols), out_dtype),
        grid_spec=pltpu.PrefetchScalarGridSpec(
            num_scalar_prefetch=0,
            grid=grid,
            in_specs=[
                pl.BlockSpec(memory_space=pltpu.SMEM),        # w (1,)
                pl.BlockSpec(memory_space=pltpu.SMEM),        # b (1,)
                pl.BlockSpec((tile_rows, cols), index_map),   # x tile
            ],
            out_specs=pl.BlockSpec((tile_rows, cols), index_map),
        ),
        compiler_params=pltpu.CompilerParams(
            dimension_semantics=_dimension_semantics(num_blocks),
            vmem_limit_bytes=vmem_limit,
        ),
        cost_estimate=cost,
    )(w32, b32, x2)

    if padded:
        out = out.reshape(-1)[:n]
    return out.reshape(x.shape)


if __name__ == "__main__":
    key = jax.random.PRNGKey(0)
    kx, kw, kb, kr, km = jax.random.split(key, 5)

    # Parameters: torch.randn(1) equivalents, deterministic.
    w = jax.random.normal(kw, (1,), dtype=jnp.float32)
    b = jax.random.normal(kb, (1,), dtype=jnp.float32)

    # 1) Small aligned input through the Pallas kernel (single full-extent block).
    x = jax.random.normal(kx, (16, 128), dtype=jnp.float32)
    y = jax.block_until_ready(linear_regression(x, w, b, force_pallas=True))
    assert jnp.allclose(y, w * x + b, atol=1e-6, rtol=1e-6), "aligned mismatch"

    # 2) Multi-block grid with a masked partial last block (small tile override).
    xm = jax.random.normal(km, (600, 128), dtype=jnp.float32)
    ym = jax.block_until_ready(
        linear_regression(xm, w, b, force_pallas=True, tile_bytes_override=64 << 10))
    assert jnp.allclose(ym, w * xm + b, atol=1e-6, rtol=1e-6), "multi-block mismatch"

    # 3) Ragged total (n % 128 != 0) exercises the rare pad path through Pallas.
    xr = jax.random.normal(kr, (5, 37), dtype=jnp.float32)
    yr = jax.block_until_ready(linear_regression(xr, w, b, force_pallas=True))
    assert jnp.allclose(yr, w * xr + b, atol=1e-6, rtol=1e-6), "ragged mismatch"

    # 4) Default path for tiny inputs stays in fused XLA (no kernel launch).
    yd = jax.block_until_ready(linear_regression(xr, w, b))
    assert jnp.allclose(yd, w * xr + b, atol=1e-6, rtol=1e-6), "xla fast-path mismatch"

    print("KERNEL_OK")
</pallas_src>

<mosaic_0001>
module attributes {stable_mosaic.version = 11 : i64} {
  func.func @_linreg_kernel(%arg0: i32, %arg1: memref<1xf32, #tpu.memory_space<smem>>, %arg2: memref<1xf32, #tpu.memory_space<smem>>, %arg3: memref<16x128xf32, #tpu.memory_space<vmem>>, %arg4: memref<16x128xf32, #tpu.memory_space<vmem>>) attributes {dimension_semantics = [#tpu.dimension_semantics<arbitrary>], iteration_bounds = array<i64: 1>, scalar_prefetch = 0 : i64, scratch_operands = 0 : i64, tpu.core_type = #tpu.core_type<tc>, window_params = [{transform_indices = @transform_0, window_bounds = array<i64: 1>}, {transform_indices = @transform_1, window_bounds = array<i64: 1>}, {transform_indices = @transform_2, window_bounds = array<i64: 16, 128>}, {transform_indices = @transform_3, window_bounds = array<i64: 16, 128>}]} {
    %c0 = arith.constant 0 : index
    %0 = memref.load %arg1[%c0] : memref<1xf32, #tpu.memory_space<smem>>
    %c0_0 = arith.constant 0 : index
    %c0_1 = arith.constant 0 : index
    %1 = vector.load %arg3[%c0_0, %c0_1] : memref<16x128xf32, #tpu.memory_space<vmem>>, vector<16x128xf32>
    %2 = vector.broadcast %0 : f32 to vector<16x128xf32>
    %3 = arith.mulf %2, %1 : vector<16x128xf32>
    %c0_2 = arith.constant 0 : index
    %4 = memref.load %arg2[%c0_2] : memref<1xf32, #tpu.memory_space<smem>>
    %5 = vector.broadcast %4 : f32 to vector<16x128xf32>
    %6 = arith.addf %3, %5 : vector<16x128xf32>
    %c0_3 = arith.constant 0 : index
    %c0_4 = arith.constant 0 : index
    %7 = vector.load %arg4[%c0_3, %c0_4] : memref<16x128xf32, #tpu.memory_space<vmem>>, vector<16x128xf32>
    tpu.vector_store %arg4[%c0_3, %c0_4], %6 {strides = array<i32>} : memref<16x128xf32, #tpu.memory_space<vmem>>, vector<16x128xf32>,
    return
  }
  func.func @transform_0(%arg0: i32) -> i32 {
    %c0_i32 = arith.constant 0 : i32
    %c0_i32_0 = arith.constant 0 : i32
    return %c0_i32 : i32
  }
  func.func @transform_1(%arg0: i32) -> i32 {
    %c0_i32 = arith.constant 0 : i32
    %c0_i32_0 = arith.constant 0 : i32
    return %c0_i32 : i32
  }
  func.func @transform_2(%arg0: i32) -> (i32, i32) {
    %c0_i32 = arith.constant 0 : i32
    %c0_i32_0 = arith.constant 0 : i32
    return %arg0, %c0_i32 : i32, i32
  }
  func.func @transform_3(%arg0: i32) -> (i32, i32) {
    %c0_i32 = arith.constant 0 : i32
    %c0_i32_0 = arith.constant 0 : i32
    return %arg0, %c0_i32 : i32, i32
  }
}

</mosaic_0001>

<bundles_post_ra>
// kernel: tpu_custom_call.1
= control target key start
LH: loop header
LB: loop body
LE: loop exit
PB: predicated region body
PF: predicated region fallthrough
CT: control target
= control target key end

     0   :  { %10 = vsyncpa [#allocation5], 0  ;;  %s172_s0 = inlined_call_operand.<no memory space> [shape: f32[1], index: 0, kind: input, shape index: {}]   ;;  %s173_s1 = inlined_call_operand.<no memory space> [shape: f32[1], index: 1, kind: input, shape index: {}]   ;;  %s174_s2 = inlined_call_operand.hbm [shape: f32[16,128], index: 2, kind: input, shape index: {}]   ;;  %s175_s3 = inlined_call_operand.hbm [shape: f32[16,128], index: 3, kind: output, shape index: {}]  }
   0x1   :  { %11 = vsyncpa [#allocation6], 0  ;;  %s112_s12 = smov [#allocation4]   ;;  %s64_s16 = scalar_lea.hbm %s174_s2, 256 }
   0x2   :  { %s21_s13 = sshll.u32 %s112_s12, 4  ;;  %p65_p0 = scmp.ne.s32.totalorder %s174_s2, %s64_s16  ;;  %s22_s13 = int_to_ptr.vmem [resolvable:$true] %s21_s13 }
   0x3   :  { %p68_p1 = scmp.lt.u32.totalorder %s64_s16, %s174_s2 }
   0x5   :  { %p70_p2 = pnand %p68_p1, %p65_p0 }
   0x7   :  { %73 = shalt.err (!%p70_p2)
}
   0x8   :  { %s74_s21 = scalar_lea.vmem %s22_s13, 256  ;;  %p79_p4 = scmp.lt.s32.totalorder %s22_s13, %s22_s13 }
   0x9   :  { %p75_p3 = scmp.ne.s32.totalorder %s22_s13, %s74_s21  ;;  %p80_p5 = scmp.lt.s32.totalorder %s74_s21, %s74_s21 }
   0xb   :  { %p81_p6 = por %p80_p5, %p79_p4 }
   0xd   :  { %p82_p7 = pnand %p81_p6, %p75_p3 }
   0xf   :  { %85 = shalt.err (!%p82_p7)
}
  0x10   :  { %s113_s22 = smov 128   ;;  %s114_s23 = smov 8  }
  0x11   :  { %27 = dma.hbm_to_vmem [thread:$0]  %s174_s2, 256, %s22_s13, [#allocation5], %s113_s22, %s113_s22, %s114_s23  }
  0x12   :  { %108 = dma.done.wait [#allocation5], 256  }
  0x13   :  { %109 = vsyncadd [#allocation5], 4294967040  ;;  %v34_v0 = vstv %s172_s0  ;;  %v32_v1 = vld [vmem:[#allocation4] sm:$0xff]  ;;  %v38_v2 = vstv %s173_s1  ;;  %v33_v3 = vld [vmem:[#allocation4 + $0x8] sm:$0xff]  ;;  %s115_s30 = smov [#allocation7]  }
  0x14   :  { %s48_s4 = sshll.u32 %s115_s30, 4  ;;  %v35_v4 = vmul.f32 %v34_v0, %v32_v1  ;;  %v36_v5 = vmul.f32 %v34_v0, %v33_v3  ;;  %s49_s4 = int_to_ptr.vmem [resolvable:$true] %s48_s4 }
  0x15   :  { %s86_s2 = scalar_lea.vmem %s49_s4, 256  ;;  %p91_p9 = scmp.lt.s32.totalorder %s49_s4, %s49_s4 }
  0x16   :  { %v39_v6 = vadd.f32 %v38_v2, %v35_v4  ;;  %v40_v7 = vadd.f32 %v38_v2, %v36_v5  ;;  %p87_p8 = scmp.ne.s32.totalorder %s49_s4, %s86_s2  ;;  %p92_p10 = scmp.lt.s32.totalorder %s86_s2, %s86_s2 }
  0x18   :  { %41 = vst [vmem:[#allocation7] sm:$0xff] %v39_v6  ;;  %42 = vst [vmem:[#allocation7 + $0x8] sm:$0xff] %v40_v7  ;;  %p93_p11 = por %p92_p10, %p91_p9 }
  0x1a   :  { %p94_p12 = pnand %p93_p11, %p87_p8 }
  0x1c   :  { %97 = shalt.err (!%p94_p12)
}
  0x1d   :  { %s98_s1 = scalar_lea.hbm %s175_s3, 256 }
  0x1e   :  { %p99_p13 = scmp.ne.s32.totalorder %s175_s3, %s98_s1  ;;  %p102_p0 = scmp.lt.u32.totalorder %s98_s1, %s175_s3 }
  0x20   :  { %p104_p1 = pnand %p102_p0, %p99_p13 }
  0x22   :  { %107 = shalt.err (!%p104_p1)
}
  0x23   :  { %54 = dma.vmem_to_hbm [thread:$0]  %s49_s4, 256, %s175_s3, [#allocation6], %s113_s22, %s113_s22, %s114_s23  }
  0x24   :  { %110 = dma.done.wait [#allocation6], 256  }
  0x25   :  { %111 = vsyncadd [#allocation6], 4294967040 }
  0x26   :  { %58 = vsyncpa [#allocation5], 1 }
  0x27   :  { %59 = vsyncpa [#allocation6], 1 }

</bundles_post_ra>
